<compile_context>
chip_gen: v7x
topology: tpu7x:2x2x1
jax: 0.10.0
libtpu: 0.0.40
codegen_flags: <defaults>
</compile_context>

<pallas_src>
from functools import partial

import jax
import jax.numpy as jnp
from jax.experimental import pallas as pl
from jax.experimental.pallas import tpu as pltpu


# ----------------------------- helpers -----------------------------
def _round_up(x, m):
    return ((x + m - 1) // m) * m


def _largest_divisor_leq(n, cap):
    for d in range(min(n, cap), 0, -1):
        if n % d == 0:
            return d
    return 1


# ----------------------------- Tiled linear (x @ W^T + b) -----------------------------
def _linear_kernel(x_ref, w_ref, b_ref, o_ref):
    x = x_ref[...].astype(w_ref.dtype)          # cast activations to bf16 for the MXU
    o_ref[...] = (jnp.dot(x, w_ref[...], preferred_element_type=jnp.float32)
                  + b_ref[...])


def fused_linear(x, w_t, b, *, tile_n=256, tile_d=512):
    """x: (N, K) f32; w_t: (K, D); b: (D,) -> (N, D) f32.

    Tiled over (N, D) with K resident; weights streamed as bf16, f32 accumulation.
    Output tiles are 128-lane aligned (lane-dense stores).
    """
    N, K = x.shape
    D = w_t.shape[1]
    tn = min(tile_n, _round_up(N, 8))
    td = min(tile_d, _round_up(D, 128))
    Np = _round_up(N, tn)
    Dp = _round_up(D, td)

    x_p = x if Np == N else jnp.pad(x, ((0, Np - N), (0, 0)))
    w_p = w_t if Dp == D else jnp.pad(w_t, ((0, 0), (0, Dp - D)))
    b_p = b if Dp == D else jnp.pad(b, ((0, Dp - D),))

    w_b = w_p.astype(jnp.bfloat16)
    b_2d = b_p.reshape(1, Dp).astype(jnp.float32)

    grid = (Np // tn, Dp // td)
    out = pl.pallas_call(
        _linear_kernel,
        out_shape=jax.ShapeDtypeStruct((Np, Dp), jnp.float32),
        grid_spec=pltpu.PrefetchScalarGridSpec(
            num_scalar_prefetch=0,
            grid=grid,
            in_specs=[
                pl.BlockSpec((tn, K), lambda i, j: (i, 0)),     # activations tile
                pl.BlockSpec((K, td), lambda i, j: (0, j)),     # weight column tile
                pl.BlockSpec((1, td), lambda i, j: (0, j)),     # bias tile
            ],
            out_specs=pl.BlockSpec((tn, td), lambda i, j: (i, j)),
        ),
        compiler_params=pltpu.CompilerParams(
            dimension_semantics=("parallel", "parallel")),
        cost_estimate=pl.CostEstimate(
            flops=2 * Np * Dp * K,
            transcendentals=0,
            bytes_accessed=4 * Np * K + 2 * K * Dp + 4 * Np * Dp),
    )(x_p, w_b, b_2d)

    if Np != N or Dp != D:
        out = out[:N, :D]
    return out


# ----------------------------- LSTM recurrence kernel -----------------------------
def _lstm_kernel(gx_ref, whh_ref, h0_ref, c0_ref, y_ref, hT_ref, cT_ref,
                 h_sc, c_sc, *, H, TS):
    tb = pl.program_id(0)

    @pl.when(tb == 0)
    def _():
        h_sc[...] = h0_ref[0]
        c_sc[...] = c0_ref[0]

    def step(s, carry):
        h, c = carry
        # Only the recurrent matmul is on the serial path (input projection hoisted).
        gates = gx_ref[s] + jnp.dot(h.astype(whh_ref.dtype), whh_ref[...],
                                    preferred_element_type=jnp.float32)
        # Gate rows pre-permuted in the wrapper to [i, f, o, g].
        sig = jax.nn.sigmoid(gates[:, :3 * H])
        g = jnp.tanh(gates[:, 3 * H:])
        i = sig[:, 0:H]
        f = sig[:, H:2 * H]
        o = sig[:, 2 * H:3 * H]
        c_new = f * c + i * g
        h_new = o * jnp.tanh(c_new)
        y_ref[s] = h_new
        return (h_new, c_new)

    h_fin, c_fin = jax.lax.fori_loop(0, TS, step, (h_sc[...], c_sc[...]),
                                     unroll=True)
    h_sc[...] = h_fin
    c_sc[...] = c_fin

    # Final hidden/cell state stored only once, on the last grid step.
    @pl.when(tb == pl.num_programs(0) - 1)
    def _():
        hT_ref[0] = h_fin
        cT_ref[0] = c_fin


def lstm_layer(x, w_ih, w_hh, b_ih, b_hh, h0, c0, *, time_block=8):
    """x: (T,B,in_dim); w_ih: (4H,in_dim); w_hh: (4H,H); b_*: (4H,); h0/c0: (1,B,H)."""
    T, B, in_dim = x.shape
    H = w_hh.shape[1]

    # Reorder gate rows [i,f,g,o] (PyTorch) -> [i,f,o,g] so the three sigmoid gates
    # form one contiguous slab inside the kernel.  Applied consistently to W and b.
    perm = jnp.concatenate([jnp.arange(0, 2 * H),
                            jnp.arange(3 * H, 4 * H),
                            jnp.arange(2 * H, 3 * H)])
    w_ih_p = jnp.take(w_ih, perm, axis=0)
    w_hh_p = jnp.take(w_hh, perm, axis=0)
    bias = jnp.take(b_ih + b_hh, perm, axis=0)            # pre-added biases

    # Pad batch up to a multiple of 8 sublanes.
    Bp = max(8, _round_up(B, 8))
    if Bp != B:
        x = jnp.pad(x, ((0, 0), (0, Bp - B), (0, 0)))
        h0 = jnp.pad(h0, ((0, 0), (0, Bp - B), (0, 0)))
        c0 = jnp.pad(c0, ((0, 0), (0, Bp - B), (0, 0)))

    # Hoisted input projection: one big MXU-friendly matmul over all timesteps.
    gx = fused_linear(x.reshape(T * Bp, in_dim), jnp.transpose(w_ih_p), bias)
    gx = gx.reshape(T, Bp, 4 * H)

    whh_t = jnp.transpose(w_hh_p).astype(jnp.bfloat16)    # (H, 4H) bf16, resident in VMEM

    TS = _largest_divisor_leq(T, time_block)
    grid = (T // TS,)

    y, hT, cT = pl.pallas_call(
        partial(_lstm_kernel, H=H, TS=TS),
        out_shape=(jax.ShapeDtypeStruct((T, Bp, H), jnp.float32),
                   jax.ShapeDtypeStruct((1, Bp, H), jnp.float32),
                   jax.ShapeDtypeStruct((1, Bp, H), jnp.float32)),
        grid_spec=pltpu.PrefetchScalarGridSpec(
            num_scalar_prefetch=0,
            grid=grid,
            in_specs=[
                pl.BlockSpec((TS, Bp, 4 * H), lambda t: (t, 0, 0)),   # gates_x time block
                pl.BlockSpec((H, 4 * H), lambda t: (0, 0)),           # W_hh^T (resident)
                pl.BlockSpec((1, Bp, H), lambda t: (0, 0, 0)),        # h0
                pl.BlockSpec((1, Bp, H), lambda t: (0, 0, 0)),        # c0
            ],
            out_specs=(
                pl.BlockSpec((TS, Bp, H), lambda t: (t, 0, 0)),       # y time block
                pl.BlockSpec((1, Bp, H), lambda t: (0, 0, 0)),        # h_T
                pl.BlockSpec((1, Bp, H), lambda t: (0, 0, 0)),        # c_T
            ),
            scratch_shapes=[pltpu.VMEM((Bp, H), jnp.float32),
                            pltpu.VMEM((Bp, H), jnp.float32)],
        ),
        compiler_params=pltpu.CompilerParams(
            dimension_semantics=("arbitrary",)),
        cost_estimate=pl.CostEstimate(
            flops=2 * T * Bp * H * 4 * H,
            transcendentals=5 * T * Bp * H,
            bytes_accessed=4 * T * Bp * 4 * H + 4 * T * Bp * H + 2 * H * 4 * H),
    )(gx, whh_t, h0, c0)

    if Bp != B:
        y = y[:, :B, :]
        hT = hT[:, :B, :]
        cT = cT[:, :B, :]
    return y, (hT, cT)


# ----------------------------- Model (glue in plain JAX) -----------------------------
def init_params(key, ntoken, ninp, nhid, nlayers, nlang, langEmbSize):
    initrange = 0.1
    keys = jax.random.split(key, 4 + 4 * nlayers)
    word_emb = jax.random.uniform(keys[0], (ntoken, ninp), minval=-initrange, maxval=initrange)
    lang_emb = jax.random.uniform(keys[1], (nlang, langEmbSize), minval=-initrange, maxval=initrange)

    rnns = []
    kidx = 2
    rnn_input = ninp + langEmbSize
    for l in range(nlayers):
        in_dim = rnn_input if l == 0 else nhid
        H = nhid if l != nlayers - 1 else ninp
        stdv = 1.0 / (H ** 0.5)
        w_ih = jax.random.uniform(keys[kidx], (4 * H, in_dim), minval=-stdv, maxval=stdv); kidx += 1
        w_hh = jax.random.uniform(keys[kidx], (4 * H, H), minval=-stdv, maxval=stdv); kidx += 1
        b_ih = jax.random.uniform(keys[kidx], (4 * H,), minval=-stdv, maxval=stdv); kidx += 1
        b_hh = jax.random.uniform(keys[kidx], (4 * H,), minval=-stdv, maxval=stdv); kidx += 1
        rnns.append(dict(w_ih=w_ih, w_hh=w_hh, b_ih=b_ih, b_hh=b_hh))

    langdec_w = jax.random.uniform(keys[kidx], (nlang, ninp), minval=-initrange, maxval=initrange)
    langdec_b = jnp.zeros((nlang,), jnp.float32)
    # decoder weight is tied to word embedding, bias zeroed (init_weights)
    return dict(word_emb=word_emb, lang_emb=lang_emb, rnns=rnns,
                langdec_w=langdec_w, langdec_b=langdec_b,
                dec_w=word_emb, dec_b=jnp.zeros((ntoken,), jnp.float32))


def rnn_model_forward(params, input_words, input_lang, hidden):
    # Embedding lookups (gather) kept in plain JAX glue.
    word_emb = jnp.take(params['word_emb'], input_words, axis=0)   # (T, B, ninp)
    lang_emb = jnp.take(params['lang_emb'], input_lang, axis=0)    # (T, B, langEmbSize)
    raw_output = jnp.concatenate([word_emb, lang_emb], axis=2)     # (T, B, ninp+langEmbSize)

    new_hidden, raw_outputs, outputs = [], [], []
    nlayers = len(params['rnns'])
    for l, p in enumerate(params['rnns']):
        raw_output, new_h = lstm_layer(raw_output, p['w_ih'], p['w_hh'],
                                       p['b_ih'], p['b_hh'],
                                       hidden[l][0], hidden[l][1])
        new_hidden.append(new_h)
        raw_outputs.append(raw_output)
        if l != nlayers - 1:
            outputs.append(raw_output)

    output = raw_output                                            # (T, B, ninp)
    outputs.append(output)

    T, B, ninp = output.shape
    pred_basis = output.reshape(T * B, ninp)

    # Fused decoders: tied word decoder + language decoder in one tiled matmul,
    # reading pred_basis once and avoiding two separate full-weight streams.
    ntoken = params['dec_w'].shape[0]
    w_cat = jnp.concatenate([params['dec_w'], params['langdec_w']], axis=0)   # (ntoken+nlang, ninp)
    b_cat = jnp.concatenate([params['dec_b'], params['langdec_b']], axis=0)
    logits = fused_linear(pred_basis, jnp.transpose(w_cat), b_cat)            # (T*B, ntoken+nlang)
    decoded = logits[:, :ntoken]
    lang_pred = logits[:, ntoken:]

    result = decoded.reshape(T, B, ntoken)
    lang_result = lang_pred.reshape(T, B, -1)
    return result, lang_result, new_hidden


def init_hidden(bsz, nhid, ninp, nlayers):
    return [(jnp.zeros((1, bsz, nhid if l != nlayers - 1 else ninp), jnp.float32),
             jnp.zeros((1, bsz, nhid if l != nlayers - 1 else ninp), jnp.float32))
            for l in range(nlayers)]


if __name__ == "__main__":
    T, B = 8, 2
    ntoken, ninp, nhid, nlayers = 64, 32, 48, 2
    nlang, langEmbSize = 4, 8

    key = jax.random.PRNGKey(0)
    pkey, wkey, lkey = jax.random.split(key, 3)

    params = init_params(pkey, ntoken, ninp, nhid, nlayers, nlang, langEmbSize)
    input_words = jax.random.randint(wkey, (T, B), 0, ntoken, dtype=jnp.int32)
    input_lang = jax.random.randint(lkey, (T, B), 0, nlang, dtype=jnp.int32)
    hidden = init_hidden(B, nhid, ninp, nlayers)

    result, lang_result, new_hidden = rnn_model_forward(params, input_words, input_lang, hidden)
    jax.block_until_ready((result, lang_result, new_hidden))

    assert result.shape == (T, B, ntoken)
    assert lang_result.shape == (T, B, nlang)
    assert new_hidden[0][0].shape == (1, B, nhid)
    assert new_hidden[-1][0].shape == (1, B, ninp)
    print("KERNEL_OK")
</pallas_src>

<mosaic_0001>
module attributes {stable_mosaic.version = 11 : i64} {
  func.func @_linear_kernel(%arg0: i32, %arg1: i32, %arg2: memref<64x40xf32, #tpu.memory_space<vmem>>, %arg3: memref<40x256xbf16, #tpu.memory_space<vmem>>, %arg4: memref<1x256xf32, #tpu.memory_space<vmem>>, %arg5: memref<64x256xf32, #tpu.memory_space<vmem>>) attributes {dimension_semantics = [#tpu.dimension_semantics<parallel>, #tpu.dimension_semantics<parallel>], iteration_bounds = array<i64: 1, 1>, scalar_prefetch = 0 : i64, scratch_operands = 0 : i64, tpu.core_type = #tpu.core_type<tc>, window_params = [{transform_indices = @transform_0, window_bounds = array<i64: 64, 40>}, {transform_indices = @transform_1, window_bounds = array<i64: 40, 256>}, {transform_indices = @transform_2, window_bounds = array<i64: 1, 256>}, {transform_indices = @transform_3, window_bounds = array<i64: 64, 256>}]} {
    %c0 = arith.constant 0 : index
    %c0_0 = arith.constant 0 : index
    %0 = vector.load %arg2[%c0, %c0_0] : memref<64x40xf32, #tpu.memory_space<vmem>>, vector<64x40xf32>
    %1 = arith.truncf %0 : vector<64x40xf32> to vector<64x40xbf16>
    %c0_1 = arith.constant 0 : index
    %c0_2 = arith.constant 0 : index
    %2 = vector.load %arg3[%c0_1, %c0_2] : memref<40x256xbf16, #tpu.memory_space<vmem>>, vector<40x256xbf16>
    %cst = arith.constant dense<0.000000e+00> : vector<64x256xf32>
    %3 = tpu.matmul %1, %2, %cst {dimension_numbers = #tpu.dot_dimension_numbers<[1], [0], [0], [1], [0, 0, 1, 1], [], []>} : vector<64x40xbf16>, vector<40x256xbf16>, vector<64x256xf32> -> vector<64x256xf32>
    %c0_3 = arith.constant 0 : index
    %c0_4 = arith.constant 0 : index
    %4 = vector.load %arg4[%c0_3, %c0_4] : memref<1x256xf32, #tpu.memory_space<vmem>>, vector<1x256xf32>
    %5 = vector.broadcast %4 : vector<1x256xf32> to vector<64x256xf32>
    %6 = arith.addf %3, %5 : vector<64x256xf32>
    %c0_5 = arith.constant 0 : index
    %c0_6 = arith.constant 0 : index
    %7 = vector.load %arg5[%c0_5, %c0_6] : memref<64x256xf32, #tpu.memory_space<vmem>>, vector<64x256xf32>
    tpu.vector_store %arg5[%c0_5, %c0_6], %6 {strides = array<i32>} : memref<64x256xf32, #tpu.memory_space<vmem>>, vector<64x256xf32>,
    return
  }
  func.func @transform_0(%arg0: i32, %arg1: i32) -> (i32, i32) {
    %c0_i32 = arith.constant 0 : i32
    %c0_i32_0 = arith.constant 0 : i32
    return %arg0, %c0_i32 : i32, i32
  }
  func.func @transform_1(%arg0: i32, %arg1: i32) -> (i32, i32) {
    %c0_i32 = arith.constant 0 : i32
    %c0_i32_0 = arith.constant 0 : i32
    return %c0_i32, %arg1 : i32, i32
  }
  func.func @transform_2(%arg0: i32, %arg1: i32) -> (i32, i32) {
    %c0_i32 = arith.constant 0 : i32
    %c0_i32_0 = arith.constant 0 : i32
    return %c0_i32, %arg1 : i32, i32
  }
  func.func @transform_3(%arg0: i32, %arg1: i32) -> (i32, i32) {
    %c0_i32 = arith.constant 0 : i32
    return %arg0, %arg1 : i32, i32
  }
}

</mosaic_0001>

<bundles_post_ra>
// kernel: tpu_custom_call.1
= control target key start
LH: loop header
LB: loop body
LE: loop exit
PB: predicated region body
PF: predicated region fallthrough
CT: control target
= control target key end

     0   :  { %v248_v2 = vmov 0   ;;  %vm83_vm0 = vcmask 1043456   ;;  %s326_s0 = inlined_call_operand.vmem [shape: f32[64,40], index: 0, kind: input, shape index: {}]   ;;  %s327_s1 = inlined_call_operand.vmem [shape: bf16[40,256], index: 1, kind: input, shape index: {}]   ;;  %s328_s2 = inlined_call_operand.vmem [shape: f32[1,256], index: 2, kind: input, shape index: {}]   ;;  %s329_s3 = inlined_call_operand.hbm [shape: f32[64,256], index: 3, kind: output, shape index: {}]  }
   0x1   :  { %v216_v0 = vld [vmem:[%s327_s1 + $0x4] ss:$8 sps:$4 sm:$0xff]   ;;  %v218_v1 = vld [vmem:[%s327_s1] ss:$8 sps:$4 sm:$0xff]   ;;  %122 = vmatprep.mubr.bf16.mxu0 %v248_v2  ;;  %142 = vmatprep.mubr.bf16.mxu1 %v248_v2  ;;  %v219_v3 = vld [vmem:[%s327_s1 + $0x14] ss:$8 sps:$4 sm:$0xff]  }
   0x2   :  { %90 = vmatprep.subr.bf16.mxu0 %v216_v0  ;;  %206 = vmatprep.subr.bf16.mxu1 %v216_v0  ;;  %v32_v4 = vld [vmem:[%s327_s1 + $0x20] sm:$0xff]  ;;  %v221_v5 = vld [vmem:[%s327_s1 + $0x10] ss:$8 sps:$4 sm:$0xff]  }
   0x3   :  { %91 = vmatpush1.bf16.msra.mxu0 %v218_v1  ;;  %209 = vmatpush1.bf16.msra.mxu1 %v218_v1  ;;  %v200_v6 = vcombine.high %v32_v4, %v32_v4  ;;  %v199_v7 = vcombine.low %v32_v4, %v32_v4  ;;  %v16_v8 = vld [vmem:[%s326_s0] sm:$0xff] }
   0x4   :  { %92 = vmatprep.subr.bf16.mxu0 %v219_v3  ;;  %207 = vmatprep.subr.bf16.mxu1 %v219_v3 }
   0x5   :  { %8 = vsyncpa [#allocation3], 0  ;;  %v17_v9 = vld [vmem:[%s326_s0 + $0x8] sm:$0xff]  ;;  %v20_v10 = vld [vmem:[%s326_s0 + $0x20] sm:$0xff]  ;;  %v85_v12 = vsel %vm83_vm0, %v199_v7, 0  ;;  %vm70_vm1 = vcmask 326656   ;;  %v35_v21 = vlaneseq }
   0x6   :  { %v21_v11 = vld [vmem:[%s326_s0 + $0x28] sm:$0xff]  ;;  %v24_v13 = vpack.c.bf16 %v17_v9, %v16_v8  ;;  %v18_v15 = vld [vmem:[%s326_s0 + $0x10] sm:$0xff]  ;;  %v19_v16 = vld [vmem:[%s326_s0 + $0x18] sm:$0xff] }
   0x7   :  { %93 = vmatpush1.bf16.msra.mxu0 %v221_v5  ;;  %210 = vmatpush1.bf16.msra.mxu1 %v221_v5  ;;  %v26_v14 = vpack.c.bf16 %v21_v11, %v20_v10  ;;  %v22_v17 = vld [vmem:[%s326_s0 + $0x30] sm:$0xff]  ;;  %v23_v18 = vld [vmem:[%s326_s0 + $0x38] sm:$0xff]  ;;  %v25_v19 = vpack.c.bf16 %v19_v16, %v18_v15  ;;  %v36_v22 = vshrl.u32 %v35_v21, 7  ;;  %v33_v24 = vld [vmem:[%s328_s2] sm:$0x3]  ;;  %s249_s0 = smov [#allocation2]  }
   0x8   :  { %201 = vmatprep.subr.msk.bf16.mxu0 %vm83_vm0, %v200_v6  ;;  %208 = vmatprep.subr.msk.bf16.mxu1 %vm83_vm0, %v200_v6  ;;  %v27_v20 = vpack.c.bf16 %v23_v18, %v22_v17  ;;  %s184_s2 = sshll.u32 %s249_s0, 4  ;;  %s185_s2 = int_to_ptr.vmem [resolvable:$true] %s184_s2 }
   0x9   :  { %v37_v23 = vsub.s32 0, %v36_v22  ;;  %v41_v25 = vsub.s32 1, %v36_v22  ;;  %s224_s12 = scalar_lea.vmem %s185_s2, 2048  ;;  %p229_p1 = scmp.lt.s32.totalorder %s185_s2, %s185_s2 }
   0xa   :  { %p225_p0 = scmp.ne.s32.totalorder %s185_s2, %s224_s12  ;;  %p230_p2 = scmp.lt.s32.totalorder %s224_s12, %s224_s12 }
   0xb   :  { %95 = vmatpush1.bf16.msra.mxu0 %v85_v12  ;;  %211 = vmatpush1.bf16.msra.mxu1 %v85_v12  ;;  %v38_v26 = vrot.slane %v33_v24, %v37_v23  ;;  %v42_v27 = vrot.slane %v33_v24, %v41_v25 }
   0xc   :  { %p231_p3 = por %p230_p2, %p229_p1 }
   0xe   :  { %202 = vmatmul.mubr.msk.bf16.vlgmr.msra.gmra.mrb[0].mxu0 %vm70_vm1, %v24_v13  ;;  %204 = vmatmul.mubr.msk.bf16.vlgmr.msra.gmra.mrb[0].mxu1 %vm70_vm1, %v26_v14  ;;  %p232_p4 = pnand %p231_p3, %p225_p0 }
   0xf   :  { %132 = vmatprep.mubr.bf16.mxu0 %v248_v2  ;;  %152 = vmatprep.mubr.bf16.mxu1 %v248_v2 }
  0x16   :  { %203 = vmatmul.mubr.msk.bf16.gmra.mrb[4].mxu0 %vm70_vm1, %v25_v19  ;;  %205 = vmatmul.mubr.msk.bf16.gmra.mrb[4].mxu1 %vm70_vm1, %v27_v20 }
  0xe1   :  { %v124_v28 = vpop.f32.mrb[0].mxu0  ;;  %v144_v29 = vpop.f32.mrb[0].mxu1 }
  0xe2   :  { %v125_v30 = vadd.f32 %v124_v28, %v38_v26  ;;  %v145_v31 = vadd.f32 %v144_v29, %v38_v26  ;;  %v126_v32 = vpop.f32.mrb[1].mxu0  ;;  %v146_v33 = vpop.f32.mrb[1].mxu1 }
  0xe3   :  { %v127_v34 = vadd.f32 %v126_v32, %v42_v27  ;;  %v147_v35 = vadd.f32 %v146_v33, %v42_v27  ;;  %v128_v36 = vpop.f32.mrb[2].mxu0  ;;  %v148_v37 = vpop.f32.mrb[2].mxu1 }
  0xe4   :  { %163 = vst [vmem:[#allocation2] sm:$0xff] %v125_v30  ;;  %171 = vst [vmem:[#allocation2 + $0x40] sm:$0xff] %v145_v31  ;;  %v129_v38 = vadd.f32 %v128_v36, %v38_v26  ;;  %v149_v39 = vadd.f32 %v148_v37, %v38_v26  ;;  %v130_v40 = vpop.f32.mrb[3].mxu0  ;;  %v150_v41 = vpop.f32.mrb[3].mxu1 }
  0xe5   :  { %164 = vst [vmem:[#allocation2 + $0x8] sm:$0xff] %v127_v34  ;;  %172 = vst [vmem:[#allocation2 + $0x48] sm:$0xff] %v147_v35  ;;  %v131_v42 = vadd.f32 %v130_v40, %v42_v27  ;;  %v151_v43 = vadd.f32 %v150_v41, %v42_v27 }
  0xe6   :  { %165 = vst [vmem:[#allocation2 + $0x10] sm:$0xff] %v129_v38  ;;  %173 = vst [vmem:[#allocation2 + $0x50] sm:$0xff] %v149_v39 }
  0xe7   :  { %166 = vst [vmem:[#allocation2 + $0x18] sm:$0xff] %v131_v42  ;;  %174 = vst [vmem:[#allocation2 + $0x58] sm:$0xff] %v151_v43 }
  0xe9   :  { %v134_v44 = vpop.f32.mrb[4].mxu0  ;;  %v154_v45 = vpop.f32.mrb[4].mxu1 }
  0xea   :  { %v135_v46 = vadd.f32 %v134_v44, %v38_v26  ;;  %v155_v47 = vadd.f32 %v154_v45, %v38_v26  ;;  %v136_v48 = vpop.f32.mrb[5].mxu0  ;;  %v156_v49 = vpop.f32.mrb[5].mxu1 }
  0xeb   :  { %v137_v50 = vadd.f32 %v136_v48, %v42_v27  ;;  %v157_v51 = vadd.f32 %v156_v49, %v42_v27  ;;  %v138_v52 = vpop.f32.mrb[6].mxu0  ;;  %v158_v53 = vpop.f32.mrb[6].mxu1 }
  0xec   :  { %167 = vst [vmem:[#allocation2 + $0x20] sm:$0xff] %v135_v46  ;;  %175 = vst [vmem:[#allocation2 + $0x60] sm:$0xff] %v155_v47  ;;  %v139_v54 = vadd.f32 %v138_v52, %v38_v26  ;;  %v159_v55 = vadd.f32 %v158_v53, %v38_v26  ;;  %v140_v56 = vpop.f32.mrb[7].mxu0  ;;  %v160_v57 = vpop.f32.mrb[7].mxu1 }
  0xed   :  { %168 = vst [vmem:[#allocation2 + $0x28] sm:$0xff] %v137_v50  ;;  %176 = vst [vmem:[#allocation2 + $0x68] sm:$0xff] %v157_v51  ;;  %v141_v58 = vadd.f32 %v140_v56, %v42_v27  ;;  %v161_v59 = vadd.f32 %v160_v57, %v42_v27 }
  0xee   :  { %169 = vst [vmem:[#allocation2 + $0x30] sm:$0xff] %v139_v54  ;;  %177 = vst [vmem:[#allocation2 + $0x70] sm:$0xff] %v159_v55 }
  0xef   :  { %170 = vst [vmem:[#allocation2 + $0x38] sm:$0xff] %v141_v58  ;;  %178 = vst [vmem:[#allocation2 + $0x78] sm:$0xff] %v161_v59 }
  0xf0   :  { %235 = shalt.err (!%p232_p4)
}
  0xf1   :  { %s236_s15 = scalar_lea.hbm %s329_s3, 2048 }
  0xf2   :  { %p237_p5 = scmp.ne.s32.totalorder %s329_s3, %s236_s15  ;;  %p240_p6 = scmp.lt.u32.totalorder %s236_s15, %s329_s3 }
  0xf4   :  { %p242_p7 = pnand %p240_p6, %p237_p5 }
  0xf6   :  { %245 = shalt.err (!%p242_p7)
}
  0xf7   :  { %s250_s20 = smov 256   ;;  %s251_s21 = smov 16  }
  0xf8   :  { %190 = dma.vmem_to_hbm [thread:$0]  %s185_s2, 2048, %s329_s3, [#allocation3], %s250_s20, %s250_s20, %s251_s21  }
  0xf9   :  { %246 = dma.done.wait [#allocation3], 2048  }
  0xfa   :  { %247 = vsyncadd [#allocation3], 4294965248 }
  0xfb   :  { %194 = vsyncpa [#allocation3], 1 }

</bundles_post_ra>
